<compile_context>
chip_gen: v7x
topology: tpu7x:2x2x1
jax: 0.10.0
libtpu: 0.0.40
codegen_flags: <defaults>
</compile_context>

<pallas_src>
import jax
import jax.numpy as jnp
from jax.experimental import pallas as pl
from jax.experimental.pallas import tpu as pltpu

_LANE = 128


def _round_up(v, m):
    return ((v + m - 1) // m) * m


def _cdiv(a, b):
    return (a + b - 1) // b


def _detector_kernel(p_ref, cw_ref, cb_ref, fw_ref, fb_ref, out_ref, pbuf_ref):
    # p_ref  : (bt, HW, 9C)  bf16 im2col patches for `bt` samples (un-padded K)
    # cw_ref : (KP, FP)      bf16 reshaped conv weights (K and F zero-padded)
    # cb_ref : (1,  FP)      f32  conv bias
    # fw_ref : (FP, CP)      f32  classifier weights (zero-padded)
    # fb_ref : (1,  CP)      f32  classifier bias
    # out_ref: (bt, CP)      f32  'cls' logits for these samples (padded classes)
    # pbuf_ref: (bt*HW, KP)  bf16 VMEM scratch for lane-aligned patches
    bt, hw, k9 = p_ref.shape
    fp = cw_ref.shape[1]

    # Lane-align K inside VMEM: zero the scratch, then place the 9C-wide patch
    # rows into lanes [0, k9).  Done every step so it is also correct if the
    # batch-parallel grid axis is sharded across TensorCores.
    pbuf_ref[...] = jnp.zeros_like(pbuf_ref)
    pbuf_ref[:, :k9] = p_ref[...].reshape(bt * hw, k9)
    patches = pbuf_ref[...]                                           # (bt*HW, KP) bf16

    # One big im2col contraction on the MXU (f32 accumulation), bias + ReLU.
    acc = jnp.dot(patches, cw_ref[...], preferred_element_type=jnp.float32)
    acc = jnp.maximum(acc + cb_ref[...], 0.0)                         # (bt*HW, FP) f32

    # Global average pool per sample: sum over the HW (sublane) axis, scale by
    # the precomputed 1/(H*W).  Feature stays f32 for the fc matmul.
    feat = jnp.sum(acc.reshape(bt, hw, fp), axis=1) * (1.0 / hw)      # (bt, FP) f32

    logits = jnp.dot(feat, fw_ref[...], preferred_element_type=jnp.float32)
    out_ref[...] = logits + fb_ref[...]                               # (bt, CP) f32


def wrapped_model_forward(x_nchw, conv_w, conv_b, fc_w, fc_b, *, samples_per_step=None):
    """Equivalent of WrappedModel(model)(x): returns model({'image': x})['cls']."""
    n, c, h, w = x_nchw.shape
    f = conv_w.shape[-1]
    num_classes = fc_w.shape[1]
    hw = h * w
    k9 = 9 * c
    assert hw % 8 == 0, "H*W must be a multiple of 8 for dense sublane tiling"

    kp = _round_up(k9, _LANE)             # in-kernel lane-padded contraction dim
    fp = _round_up(f, _LANE)              # lane-padded conv output channels
    cp = _round_up(num_classes, _LANE)    # lane-padded class dim

    bt = samples_per_step or min(n, 8)    # samples per grid step
    nb = _cdiv(n, bt)
    n_pad = nb * bt

    # ---- glue (XLA wrapper): NCHW -> NHWC + single bf16 cast, halo pad, 9 shifted
    #      taps concatenated (tap order kh, kw, c matches conv_w.reshape(9C, F)).
    #      The patches keep their natural 9C last dim -- no HBM lane padding.
    x = jnp.transpose(x_nchw, (0, 2, 3, 1)).astype(jnp.bfloat16)
    xp = jnp.pad(x, ((0, n_pad - n), (1, 1), (1, 1), (0, 0)))
    taps = [xp[:, kh:kh + h, kw:kw + w, :] for kh in range(3) for kw in range(3)]
    patches = jnp.concatenate(taps, axis=-1).reshape(n_pad, hw, k9)   # bf16

    cw = jnp.pad(conv_w.astype(jnp.float32).reshape(k9, f),
                 ((0, kp - k9), (0, fp - f))).astype(jnp.bfloat16)
    cb = jnp.pad(conv_b.astype(jnp.float32), (0, fp - f)).reshape(1, fp)
    fw = jnp.pad(fc_w.astype(jnp.float32),
                 ((0, fp - f), (0, cp - num_classes)))                # stays f32
    fb = jnp.pad(fc_b.astype(jnp.float32), (0, cp - num_classes)).reshape(1, cp)

    cost = pl.CostEstimate(
        flops=2 * n_pad * hw * kp * fp + 2 * n_pad * fp * cp,
        transcendentals=0,
        bytes_accessed=(patches.size * 2 + cw.size * 2 + cb.size * 4
                        + fw.size * 4 + fb.size * 4 + n_pad * cp * 4),
    )

    out = pl.pallas_call(
        _detector_kernel,
        out_shape=jax.ShapeDtypeStruct((n_pad, cp), jnp.float32),
        grid=(nb,),
        in_specs=[
            # bt samples' im2col rows per grid step (pipelined over batch blocks)
            pl.BlockSpec((bt, hw, k9), lambda i: (i, 0, 0)),
            pl.BlockSpec((kp, fp), lambda i: (0, 0)),
            pl.BlockSpec((1, fp), lambda i: (0, 0)),
            pl.BlockSpec((fp, cp), lambda i: (0, 0)),
            pl.BlockSpec((1, cp), lambda i: (0, 0)),
        ],
        out_specs=pl.BlockSpec((bt, cp), lambda i: (i, 0)),
        scratch_shapes=[pltpu.VMEM((bt * hw, kp), jnp.bfloat16)],
        compiler_params=pltpu.CompilerParams(
            dimension_semantics=("parallel",),        # batch blocks across TCs (v7x)
            vmem_limit_bytes=32 * 1024 * 1024,
        ),
        cost_estimate=cost,
    )(patches, cw, cb, fw, fb)

    return out[:n, :num_classes]


def _reference_forward(x_nchw, conv_w, conv_b, fc_w, fc_b):
    """Pure-JAX f32 reference for correctness checking."""
    x = jnp.transpose(x_nchw, (0, 2, 3, 1)).astype(jnp.float32)
    y = jax.lax.conv_general_dilated(
        x, conv_w, window_strides=(1, 1), padding="SAME",
        dimension_numbers=("NHWC", "HWIO", "NHWC"),
    ) + conv_b
    y = jnp.maximum(y, 0.0)
    feat = y.mean(axis=(1, 2))
    return feat @ fc_w + fc_b


if __name__ == "__main__":
    key = jax.random.PRNGKey(0)
    k_x, k_cw, k_cb, k_fw, k_fb = jax.random.split(key, 5)

    N, C, H, W = 2, 4, 16, 16       # NCHW input, like the PyTorch module
    F = 8                           # conv output channels
    NUM_CLASSES = 10                # 'cls' logits

    x = jax.random.normal(k_x, (N, C, H, W), dtype=jnp.float32)
    conv_w = 0.1 * jax.random.normal(k_cw, (3, 3, C, F), dtype=jnp.float32)
    conv_b = 0.1 * jax.random.normal(k_cb, (F,), dtype=jnp.float32)
    fc_w = 0.1 * jax.random.normal(k_fw, (F, NUM_CLASSES), dtype=jnp.float32)
    fc_b = 0.1 * jax.random.normal(k_fb, (NUM_CLASSES,), dtype=jnp.float32)

    logits = wrapped_model_forward(x, conv_w, conv_b, fc_w, fc_b)
    jax.block_until_ready(logits)

    ref = _reference_forward(x, conv_w, conv_b, fc_w, fc_b)
    assert logits.shape == (N, NUM_CLASSES)
    # bf16 conv operands with f32 accumulation (fc stays f32) -> loose tolerance.
    assert jnp.allclose(logits, ref, atol=2e-2, rtol=2e-2), "mismatch vs reference"

    print("KERNEL_OK")
</pallas_src>

<mosaic_0001>
module attributes {stable_mosaic.version = 11 : i64} {
  func.func @_detector_kernel(%arg0: i32, %arg1: memref<2x256x36xbf16, #tpu.memory_space<vmem>>, %arg2: memref<128x128xbf16, #tpu.memory_space<vmem>>, %arg3: memref<1x128xf32, #tpu.memory_space<vmem>>, %arg4: memref<128x128xf32, #tpu.memory_space<vmem>>, %arg5: memref<1x128xf32, #tpu.memory_space<vmem>>, %arg6: memref<2x128xf32, #tpu.memory_space<vmem>>, %arg7: memref<512x128xbf16, #tpu.memory_space<vmem>>) attributes {dimension_semantics = [#tpu.dimension_semantics<parallel>], iteration_bounds = array<i64: 1>, scalar_prefetch = 0 : i64, scratch_operands = 1 : i64, tpu.core_type = #tpu.core_type<tc>, window_params = [{transform_indices = @transform_0, window_bounds = array<i64: 2, 256, 36>}, {pipeline_mode = #tpu.pipeline_mode<synchronous>, transform_indices = @transform_1, window_bounds = array<i64: 128, 128>}, {pipeline_mode = #tpu.pipeline_mode<synchronous>, transform_indices = @transform_2, window_bounds = array<i64: 1, 128>}, {pipeline_mode = #tpu.pipeline_mode<synchronous>, transform_indices = @transform_3, window_bounds = array<i64: 128, 128>}, {pipeline_mode = #tpu.pipeline_mode<synchronous>, transform_indices = @transform_4, window_bounds = array<i64: 1, 128>}, {transform_indices = @transform_5, window_bounds = array<i64: 2, 128>}]} {
    %cst = arith.constant 0.000000e+00 : bf16
    %0 = vector.broadcast %cst : bf16 to vector<512x128xbf16>
    %c0 = arith.constant 0 : index
    %c0_0 = arith.constant 0 : index
    %1 = vector.load %arg7[%c0, %c0_0] : memref<512x128xbf16, #tpu.memory_space<vmem>>, vector<512x128xbf16>
    tpu.vector_store %arg7[%c0, %c0_0], %0 {strides = array<i32>} : memref<512x128xbf16, #tpu.memory_space<vmem>>, vector<512x128xbf16>,
    %c0_1 = arith.constant 0 : index
    %c0_2 = arith.constant 0 : index
    %c0_3 = arith.constant 0 : index
    %2 = vector.load %arg1[%c0_1, %c0_2, %c0_3] : memref<2x256x36xbf16, #tpu.memory_space<vmem>>, vector<2x256x36xbf16>
    %3 = vector.shape_cast %2 : vector<2x256x36xbf16> to vector<512x36xbf16>
    %c0_4 = arith.constant 0 : index
    %c0_5 = arith.constant 0 : index
    %4 = vector.load %arg7[%c0_4, %c0_5] : memref<512x128xbf16, #tpu.memory_space<vmem>>, vector<512x36xbf16>
    tpu.vector_store %arg7[%c0_4, %c0_5], %3 {strides = array<i32>} : memref<512x128xbf16, #tpu.memory_space<vmem>>, vector<512x36xbf16>,
    %c0_6 = arith.constant 0 : index
    %c0_7 = arith.constant 0 : index
    %5 = vector.load %arg7[%c0_6, %c0_7] : memref<512x128xbf16, #tpu.memory_space<vmem>>, vector<512x128xbf16>
    %c0_8 = arith.constant 0 : index
    %c0_9 = arith.constant 0 : index
    %6 = vector.load %arg2[%c0_8, %c0_9] : memref<128x128xbf16, #tpu.memory_space<vmem>>, vector<128x128xbf16>
    %cst_10 = arith.constant dense<0.000000e+00> : vector<512x128xf32>
    %7 = tpu.matmul %5, %6, %cst_10 {dimension_numbers = #tpu.dot_dimension_numbers<[1], [0], [0], [1], [0, 0, 1, 1], [], []>} : vector<512x128xbf16>, vector<128x128xbf16>, vector<512x128xf32> -> vector<512x128xf32>
    %c0_11 = arith.constant 0 : index
    %c0_12 = arith.constant 0 : index
    %8 = vector.load %arg3[%c0_11, %c0_12] : memref<1x128xf32, #tpu.memory_space<vmem>>, vector<1x128xf32>
    %9 = vector.broadcast %8 : vector<1x128xf32> to vector<512x128xf32>
    %10 = arith.addf %7, %9 : vector<512x128xf32>
    %cst_13 = arith.constant 0.000000e+00 : f32
    %11 = vector.broadcast %cst_13 : f32 to vector<512x128xf32>
    %12 = arith.maximumf %10, %11 : vector<512x128xf32>
    %13 = vector.shape_cast %12 : vector<512x128xf32> to vector<2x256x128xf32>
    %cst_14 = arith.constant dense<0.000000e+00> : vector<2x128xf32>
    %14 = vector.multi_reduction <add>, %13, %cst_14 [1] : vector<2x256x128xf32> to vector<2x128xf32>
    %cst_15 = arith.constant 3.906250e-03 : f32
    %15 = vector.broadcast %cst_15 : f32 to vector<2x128xf32>
    %16 = arith.mulf %14, %15 : vector<2x128xf32>
    %c0_16 = arith.constant 0 : index
    %c0_17 = arith.constant 0 : index
    %17 = vector.load %arg4[%c0_16, %c0_17] : memref<128x128xf32, #tpu.memory_space<vmem>>, vector<128x128xf32>
    %cst_18 = arith.constant dense<0.000000e+00> : vector<2x128xf32>
    %18 = tpu.matmul %16, %17, %cst_18 {dimension_numbers = #tpu.dot_dimension_numbers<[1], [0], [0], [1], [0, 0, 1, 1], [], []>} : vector<2x128xf32>, vector<128x128xf32>, vector<2x128xf32> -> vector<2x128xf32>
    %c0_19 = arith.constant 0 : index
    %c0_20 = arith.constant 0 : index
    %19 = vector.load %arg5[%c0_19, %c0_20] : memref<1x128xf32, #tpu.memory_space<vmem>>, vector<1x128xf32>
    %20 = vector.broadcast %19 : vector<1x128xf32> to vector<2x128xf32>
    %21 = arith.addf %18, %20 : vector<2x128xf32>
    %c0_21 = arith.constant 0 : index
    %c0_22 = arith.constant 0 : index
    %22 = vector.load %arg6[%c0_21, %c0_22] : memref<2x128xf32, #tpu.memory_space<vmem>>, vector<2x128xf32>
    tpu.vector_store %arg6[%c0_21, %c0_22], %21 {strides = array<i32>} : memref<2x128xf32, #tpu.memory_space<vmem>>, vector<2x128xf32>,
    return
  }
  func.func @transform_0(%arg0: i32) -> (i32, i32, i32) {
    %c0_i32 = arith.constant 0 : i32
    %c0_i32_0 = arith.constant 0 : i32
    %c0_i32_1 = arith.constant 0 : i32
    return %arg0, %c0_i32, %c0_i32_0 : i32, i32, i32
  }
  func.func @transform_1(%arg0: i32) -> (i32, i32) {
    %c0_i32 = arith.constant 0 : i32
    %c0_i32_0 = arith.constant 0 : i32
    %c0_i32_1 = arith.constant 0 : i32
    return %c0_i32, %c0_i32_0 : i32, i32
  }
  func.func @transform_2(%arg0: i32) -> (i32, i32) {
    %c0_i32 = arith.constant 0 : i32
    %c0_i32_0 = arith.constant 0 : i32
    %c0_i32_1 = arith.constant 0 : i32
    return %c0_i32, %c0_i32_0 : i32, i32
  }
  func.func @transform_3(%arg0: i32) -> (i32, i32) {
    %c0_i32 = arith.constant 0 : i32
    %c0_i32_0 = arith.constant 0 : i32
    %c0_i32_1 = arith.constant 0 : i32
    return %c0_i32, %c0_i32_0 : i32, i32
  }
  func.func @transform_4(%arg0: i32) -> (i32, i32) {
    %c0_i32 = arith.constant 0 : i32
    %c0_i32_0 = arith.constant 0 : i32
    %c0_i32_1 = arith.constant 0 : i32
    return %c0_i32, %c0_i32_0 : i32, i32
  }
  func.func @transform_5(%arg0: i32) -> (i32, i32) {
    %c0_i32 = arith.constant 0 : i32
    %c0_i32_0 = arith.constant 0 : i32
    return %arg0, %c0_i32 : i32, i32
  }
}

</mosaic_0001>

<bundles_post_ra>
// kernel: tpu_custom_call.1
= control target key start
LH: loop header
LB: loop body
LE: loop exit
PB: predicated region body
PF: predicated region fallthrough
CT: control target
= control target key end

     0   :  { %v1311_v2 = vmov 0   ;;  %vm310_vm0 = vcmask 293888   ;;  %s1726_s0 = inlined_call_operand.vmem [shape: bf16[2,256,36], index: 0, kind: input, shape index: {}]   ;;  %s1727_s1 = inlined_call_operand.vmem [shape: bf16[128,128], index: 1, kind: input, shape index: {}]   ;;  %s1728_s2 = inlined_call_operand.vmem [shape: f32[1,128], index: 2, kind: input, shape index: {}]   ;;  %s1729_s3 = inlined_call_operand.vmem [shape: f32[128,128], index: 3, kind: input, shape index: {}]   ;;  %s1730_s4 = inlined_call_operand.vmem [shape: f32[1,128], index: 4, kind: input, shape index: {}]   ;;  %s1731_s5 = inlined_call_operand.hbm [shape: f32[2,128], index: 5, kind: output, shape index: {}]  }
   0x1   :  { %v1247_v0 = vld [vmem:[%s1727_s1] sm:$0xff]   ;;  %v1248_v1 = vld [vmem:[%s1727_s1 + $0x8] sm:$0xff]   ;;  %22 = vst [vmem:[#allocation2] sm:$0xff] %v1311_v2  ;;  %23 = vst [vmem:[#allocation2 + $0x8] sm:$0xff] %v1311_v2 }
   0x2   :  { %24 = vst [vmem:[#allocation2 + $0x10] sm:$0xff] %v1311_v2  ;;  %25 = vst [vmem:[#allocation2 + $0x18] sm:$0xff] %v1311_v2  ;;  %1087 = vmatprep.subr.bf16.mxu0 %v1247_v0  ;;  %1226 = vmatprep.subr.bf16.mxu1 %v1247_v0  ;;  %v1249_v3 = vld [vmem:[%s1727_s1 + $0x10] sm:$0xff]   ;;  %v1250_v4 = vld [vmem:[%s1727_s1 + $0x18] sm:$0xff]  }
   0x3   :  { %26 = vst [vmem:[#allocation2 + $0x20] sm:$0xff] %v1311_v2  ;;  %27 = vst [vmem:[#allocation2 + $0x28] sm:$0xff] %v1311_v2  ;;  %1088 = vmatpush3.bf16.msra.mxu0 %v1247_v0  ;;  %1234 = vmatpush3.bf16.msra.mxu1 %v1247_v0  ;;  %v1255_v5 = vld [vmem:[%s1726_s0] sm:$0xff]   ;;  %v1256_v6 = vld [vmem:[%s1726_s0 + $0x8] sm:$0xff]  }
   0x4   :  { %28 = vst [vmem:[#allocation2 + $0x30] sm:$0xff] %v1311_v2  ;;  %29 = vst [vmem:[#allocation2 + $0x38] sm:$0xff] %v1311_v2  ;;  %1089 = vmatprep.subr.bf16.mxu0 %v1248_v1  ;;  %1227 = vmatprep.subr.bf16.mxu1 %v1248_v1  ;;  %v1251_v7 = vld [vmem:[%s1727_s1 + $0x20] sm:$0xff]   ;;  %v1257_v8 = vld [vmem:[%s1726_s0 + $0x10] sm:$0xff]  }
   0x5   :  { %30 = vst [vmem:[#allocation2 + $0x40] sm:$0xff] %v1311_v2  ;;  %31 = vst [vmem:[#allocation2 + $0x48] sm:$0xff] %v1311_v2  ;;  %v1258_v9 = vld [vmem:[%s1726_s0 + $0x18] sm:$0xff]   ;;  %v1259_v10 = vld [vmem:[%s1726_s0 + $0x20] sm:$0xff]  }
   0x6   :  { %32 = vst [vmem:[#allocation2 + $0x50] sm:$0xff] %v1311_v2  ;;  %33 = vst [vmem:[#allocation2 + $0x58] sm:$0xff] %v1311_v2  ;;  %v1260_v11 = vld [vmem:[%s1726_s0 + $0x28] sm:$0xff]   ;;  %v1261_v13 = vld [vmem:[%s1726_s0 + $0x30] sm:$0xff]  }
   0x7   :  { %34 = vst [vmem:[#allocation2 + $0x60] sm:$0xff] %v1311_v2  ;;  %35 = vst [vmem:[#allocation2 + $0x68] sm:$0xff] %v1311_v2  ;;  %1090 = vmatpush3.bf16.msra.mxu0 %v1248_v1  ;;  %1235 = vmatpush3.bf16.msra.mxu1 %v1248_v1  ;;  %v1252_v12 = vld [vmem:[%s1727_s1 + $0x28] sm:$0xff]   ;;  %v1262_v14 = vld [vmem:[%s1726_s0 + $0x38] sm:$0xff]  }
   0x8   :  { %36 = vst [vmem:[#allocation2 + $0x70] sm:$0xff] %v1311_v2  ;;  %37 = vst [vmem:[#allocation2 + $0x78] sm:$0xff] %v1311_v2  ;;  %1091 = vmatprep.subr.bf16.mxu0 %v1249_v3  ;;  %1228 = vmatprep.subr.bf16.mxu1 %v1249_v3  ;;  %v1263_v15 = vld [vmem:[%s1726_s0 + $0x40] sm:$0xff]   ;;  %v1264_v17 = vld [vmem:[%s1726_s0 + $0x48] sm:$0xff]  }
   0x9   :  { %38 = vst [vmem:[#allocation2 + $0x80] sm:$0xff] %v1311_v2  ;;  %39 = vst [vmem:[#allocation2 + $0x88] sm:$0xff] %v1311_v2  ;;  %v1265_v18 = vld [vmem:[%s1726_s0 + $0x50] sm:$0xff]   ;;  %v1266_v20 = vld [vmem:[%s1726_s0 + $0x58] sm:$0xff]  }
   0xa   :  { %40 = vst [vmem:[#allocation2 + $0x90] sm:$0xff] %v1311_v2  ;;  %41 = vst [vmem:[#allocation2 + $0x98] sm:$0xff] %v1311_v2  ;;  %v1253_v19 = vld [vmem:[%s1727_s1 + $0x30] sm:$0xff]   ;;  %v1267_v21 = vld [vmem:[%s1726_s0 + $0x60] sm:$0xff]  }
   0xb   :  { %42 = vst [vmem:[#allocation2 + $0xa0] sm:$0xff] %v1311_v2  ;;  %43 = vst [vmem:[#allocation2 + $0xa8] sm:$0xff] %v1311_v2  ;;  %1092 = vmatpush3.bf16.msra.mxu0 %v1249_v3  ;;  %1236 = vmatpush3.bf16.msra.mxu1 %v1249_v3  ;;  %v1254_v22 = vld [vmem:[%s1727_s1 + $0x38] sm:$0xff]   ;;  %v1268_v23 = vld [vmem:[%s1726_s0 + $0x68] sm:$0xff]  }
   0xc   :  { %44 = vst [vmem:[#allocation2 + $0xb0] sm:$0xff] %v1311_v2  ;;  %45 = vst [vmem:[#allocation2 + $0xb8] sm:$0xff] %v1311_v2  ;;  %1093 = vmatprep.subr.bf16.mxu0 %v1250_v4  ;;  %1229 = vmatprep.subr.bf16.mxu1 %v1250_v4  ;;  %v1269_v24 = vld [vmem:[%s1726_s0 + $0x70] sm:$0xff]   ;;  %v1270_v25 = vld [vmem:[%s1726_s0 + $0x78] sm:$0xff]  }
   0xd   :  { %46 = vst [vmem:[#allocation2 + $0xc0] sm:$0xff] %v1311_v2  ;;  %47 = vst [vmem:[#allocation2 + $0xc8] sm:$0xff] %v1311_v2  ;;  %v1271_v26 = vld [vmem:[%s1726_s0 + $0x80] sm:$0xff]   ;;  %v1272_v27 = vld [vmem:[%s1726_s0 + $0x88] sm:$0xff]  }
   0xe   :  { %48 = vst [vmem:[#allocation2 + $0xd0] sm:$0xff] %v1311_v2  ;;  %49 = vst [vmem:[#allocation2 + $0xd8] sm:$0xff] %v1311_v2  ;;  %v1273_v29 = vld [vmem:[%s1726_s0 + $0x90] sm:$0xff]   ;;  %v1274_v31 = vld [vmem:[%s1726_s0 + $0x98] sm:$0xff]  }
   0xf   :  { %50 = vst [vmem:[#allocation2 + $0xe0] sm:$0xff] %v1311_v2  ;;  %51 = vst [vmem:[#allocation2 + $0xe8] sm:$0xff] %v1311_v2  ;;  %1094 = vmatpush3.bf16.msra.mxu0 %v1250_v4  ;;  %1237 = vmatpush3.bf16.msra.mxu1 %v1250_v4  ;;  %v1275_v32 = vld [vmem:[%s1726_s0 + $0xa0] sm:$0xff]   ;;  %v1276_v33 = vld [vmem:[%s1726_s0 + $0xa8] sm:$0xff]  }
  0x10   :  { %52 = vst [vmem:[#allocation2 + $0xf0] sm:$0xff] %v1311_v2  ;;  %53 = vst [vmem:[#allocation2 + $0xf8] sm:$0xff] %v1311_v2  ;;  %1095 = vmatprep.subr.bf16.mxu0 %v1251_v7  ;;  %1230 = vmatprep.subr.bf16.mxu1 %v1251_v7  ;;  %v1277_v34 = vld [vmem:[%s1726_s0 + $0xb0] sm:$0xff]   ;;  %v1278_v36 = vld [vmem:[%s1726_s0 + $0xb8] sm:$0xff]  }
  0x11   :  { %311 = vst.msk [vmem:[#allocation2] sm:$0xff] %vm310_vm0, %v1255_v5  ;;  %312 = vst.msk [vmem:[#allocation2 + $0x8] sm:$0xff] %vm310_vm0, %v1256_v6  ;;  %v1279_v38 = vld [vmem:[%s1726_s0 + $0xc0] sm:$0xff]   ;;  %v1280_v40 = vld [vmem:[%s1726_s0 + $0xc8] sm:$0xff]  }
  0x12   :  { %313 = vst.msk [vmem:[#allocation2 + $0x10] sm:$0xff] %vm310_vm0, %v1257_v8  ;;  %314 = vst.msk [vmem:[#allocation2 + $0x18] sm:$0xff] %vm310_vm0, %v1258_v9  ;;  %v1281_v42 = vld [vmem:[%s1726_s0 + $0xd0] sm:$0xff]   ;;  %v1282_v44 = vld [vmem:[%s1726_s0 + $0xd8] sm:$0xff]  }
  0x13   :  { %315 = vst.msk [vmem:[#allocation2 + $0x20] sm:$0xff] %vm310_vm0, %v1259_v10  ;;  %316 = vst.msk [vmem:[#allocation2 + $0x28] sm:$0xff] %vm310_vm0, %v1260_v11  ;;  %1096 = vmatpush3.bf16.msra.mxu0 %v1251_v7  ;;  %1238 = vmatpush3.bf16.msra.mxu1 %v1251_v7  ;;  %v1283_v45 = vld [vmem:[%s1726_s0 + $0xe0] sm:$0xff]   ;;  %v1284_v47 = vld [vmem:[%s1726_s0 + $0xe8] sm:$0xff]  }
  0x14   :  { %317 = vst.msk [vmem:[#allocation2 + $0x30] sm:$0xff] %vm310_vm0, %v1261_v13  ;;  %318 = vst.msk [vmem:[#allocation2 + $0x38] sm:$0xff] %vm310_vm0, %v1262_v14  ;;  %1097 = vmatprep.subr.bf16.mxu0 %v1252_v12  ;;  %1231 = vmatprep.subr.bf16.mxu1 %v1252_v12  ;;  %v1285_v49 = vld [vmem:[%s1726_s0 + $0xf0] sm:$0xff]   ;;  %v1286_v52 = vld [vmem:[%s1726_s0 + $0xf8] sm:$0xff]  }
  0x15   :  { %319 = vst.msk [vmem:[#allocation2 + $0x40] sm:$0xff] %vm310_vm0, %v1263_v15  ;;  %320 = vst.msk [vmem:[#allocation2 + $0x48] sm:$0xff] %vm310_vm0, %v1264_v17 }
  0x16   :  { %321 = vst.msk [vmem:[#allocation2 + $0x50] sm:$0xff] %vm310_vm0, %v1265_v18  ;;  %322 = vst.msk [vmem:[#allocation2 + $0x58] sm:$0xff] %vm310_vm0, %v1266_v20 }
  0x17   :  { %1098 = vmatpush3.bf16.msra.mxu0 %v1252_v12  ;;  %1239 = vmatpush3.bf16.msra.mxu1 %v1252_v12  ;;  %323 = vst.msk [vmem:[#allocation2 + $0x60] sm:$0xff] %vm310_vm0, %v1267_v21  ;;  %324 = vst.msk [vmem:[#allocation2 + $0x68] sm:$0xff] %vm310_vm0, %v1268_v23 }
  0x18   :  { %v343_v16 = vld [vmem:[#allocation2] sm:$0xff]  ;;  %1099 = vmatprep.subr.bf16.mxu0 %v1253_v19  ;;  %1232 = vmatprep.subr.bf16.mxu1 %v1253_v19  ;;  %325 = vst.msk [vmem:[#allocation2 + $0x70] sm:$0xff] %vm310_vm0, %v1269_v24  ;;  %326 = vst.msk [vmem:[#allocation2 + $0x78] sm:$0xff] %vm310_vm0, %v1270_v25  ;;  %v344_v28 = vld [vmem:[#allocation2 + $0x8] sm:$0xff] }
  0x19   :  { %1103 = vmatprep.mubr.bf16.mxu0 %v343_v16  ;;  %327 = vst.msk [vmem:[#allocation2 + $0x80] sm:$0xff] %vm310_vm0, %v1271_v26  ;;  %v345_v30 = vld [vmem:[#allocation2 + $0x10] sm:$0xff]  ;;  %328 = vst.msk [vmem:[#allocation2 + $0x88] sm:$0xff] %vm310_vm0, %v1272_v27  ;;  %v346_v35 = vld [vmem:[#allocation2 + $0x18] sm:$0xff] }
  0x1a   :  { %329 = vst.msk [vmem:[#allocation2 + $0x90] sm:$0xff] %vm310_vm0, %v1273_v29  ;;  %330 = vst.msk [vmem:[#allocation2 + $0x98] sm:$0xff] %vm310_vm0, %v1274_v31  ;;  %v347_v37 = vld [vmem:[#allocation2 + $0x20] sm:$0xff]  ;;  %v348_v46 = vld [vmem:[#allocation2 + $0x28] sm:$0xff] }
  0x1b   :  { %1100 = vmatpush3.bf16.msra.mxu0 %v1253_v19  ;;  %1240 = vmatpush3.bf16.msra.mxu1 %v1253_v19  ;;  %331 = vst.msk [vmem:[#allocation2 + $0xa0] sm:$0xff] %vm310_vm0, %v1275_v32  ;;  %332 = vst.msk [vmem:[#allocation2 + $0xa8] sm:$0xff] %vm310_vm0, %v1276_v33  ;;  %v349_v48 = vld [vmem:[#allocation2 + $0x30] sm:$0xff] }
  0x1c   :  { %1101 = vmatprep.subr.bf16.mxu0 %v1254_v22  ;;  %1233 = vmatprep.subr.bf16.mxu1 %v1254_v22  ;;  %333 = vst.msk [vmem:[#allocation2 + $0xb0] sm:$0xff] %vm310_vm0, %v1277_v34  ;;  %334 = vst.msk [vmem:[#allocation2 + $0xb8] sm:$0xff] %vm310_vm0, %v1278_v36 }
  0x1d   :  { %335 = vst.msk [vmem:[#allocation2 + $0xc0] sm:$0xff] %vm310_vm0, %v1279_v38  ;;  %336 = vst.msk [vmem:[#allocation2 + $0xc8] sm:$0xff] %vm310_vm0, %v1280_v40 }
  0x1e   :  { %337 = vst.msk [vmem:[#allocation2 + $0xd0] sm:$0xff] %vm310_vm0, %v1281_v42  ;;  %338 = vst.msk [vmem:[#allocation2 + $0xd8] sm:$0xff] %vm310_vm0, %v1282_v44 }
  0x1f   :  { %1102 = vmatpush3.bf16.msra.mxu0 %v1254_v22  ;;  %1241 = vmatpush3.bf16.msra.mxu1 %v1254_v22  ;;  %339 = vst.msk [vmem:[#allocation2 + $0xe0] sm:$0xff] %vm310_vm0, %v1283_v45  ;;  %340 = vst.msk [vmem:[#allocation2 + $0xe8] sm:$0xff] %vm310_vm0, %v1284_v47 }
  0x20   :  { %341 = vst.msk [vmem:[#allocation2 + $0xf0] sm:$0xff] %vm310_vm0, %v1285_v49 }
  0x21   :  { %v361_v39 = vld [vmem:[#allocation2 + $0x90] sm:$0xff]  ;;  %v362_v41 = vld [vmem:[#allocation2 + $0x98] sm:$0xff] }
  0x22   :  { %1104 = vmatmul.mubr.bf16.vlgmr.msra.gmra.mrb[0].mxu0 %v344_v28  ;;  %1139 = vmatprep.mubr.bf16.mxu1 %v361_v39  ;;  %v363_v43 = vld [vmem:[#allocation2 + $0xa0] sm:$0xff]  ;;  %v364_v50 = vld [vmem:[#allocation2 + $0xa8] sm:$0xff] }
  0x23   :  { %1107 = vmatprep.mubr.bf16.mxu0 %v345_v30  ;;  %1140 = vmatmul.mubr.bf16.vlgmr.msra.gmra.mrb[0].mxu1 %v362_v41  ;;  %v365_v51 = vld [vmem:[#allocation2 + $0xb0] sm:$0xff] }
  0x24   :  { %1143 = vmatprep.mubr.bf16.mxu1 %v363_v43 }
  0x2a   :  { %1108 = vmatmul.mubr.bf16.gmra.mrb[4].mxu0 %v346_v35 }
  0x2b   :  { %1111 = vmatprep.mubr.bf16.mxu0 %v347_v37 }
  0x2c   :  { %10 = vsyncpa [#allocation4], 0  ;;  %1144 = vmatmul.mubr.bf16.gmra.mrb[4].mxu1 %v364_v50  ;;  %342 = vst.msk [vmem:[#allocation2 + $0xf8] sm:$0xff] %vm310_vm0, %v1286_v52  ;;  %v350_v53 = vld [vmem:[#allocation2 + $0x38] sm:$0xff]  ;;  %v351_v55 = vld [vmem:[#allocation2 + $0x40] sm:$0xff]  ;;  %v1312_v11 = vmov 0.0|0.0  }
  0x2d   :  { %1147 = vmatprep.mubr.bf16.mxu1 %v365_v51  ;;  %v366_v54 = vld [vmem:[#allocation2 + $0xb8] sm:$0xff]  ;;  %v367_v56 = vld [vmem:[#allocation2 + $0xc0] sm:$0xff]  ;;  %v352_v57 = vld [vmem:[#allocation2 + $0x48] sm:$0xff]  ;;  %1202 = vmatprep.subr.bf16.mxu1 %v1312_v11  ;;  %vm1313_vm1 = vmmov 0   ;;  %vm900_vm2 = vcmask 1041409   ;;  %s1315_s27 = smov [#allocation3]  }
  0x2e   :  { %v368_v58 = vld [vmem:[#allocation2 + $0xc8] sm:$0xff]  ;;  %v353_v59 = vld [vmem:[#allocation2 + $0x50] sm:$0xff]  ;;  %v354_v61 = vld [vmem:[#allocation2 + $0x58] sm:$0xff]  ;;  %s980_s28 = sshll.u32 %s1315_s27, 4  ;;  %s981_s28 = int_to_ptr.vmem [resolvable:$true] %s980_s28 }
  0x2f   :  { %v369_v60 = vld [vmem:[#allocation2 + $0xd0] sm:$0xff]  ;;  %v370_v62 = vld [vmem:[#allocation2 + $0xd8] sm:$0xff]  ;;  %v355_v63 = vld [vmem:[#allocation2 + $0x60] sm:$0xff]  ;;  %s1287_s29 = scalar_lea.vmem %s981_s28, 32  ;;  %p1292_p1 = scmp.lt.s32.totalorder %s981_s28, %s981_s28 }
  0x30   :  { %v371_v0 = vld [vmem:[#allocation2 + $0xe0] sm:$0xff]  ;;  %v356_v1 = vld [vmem:[#allocation2 + $0x68] sm:$0xff]  ;;  %v357_v3 = vld [vmem:[#allocation2 + $0x70] sm:$0xff]  ;;  %p1288_p0 = scmp.ne.s32.totalorder %s981_s28, %s1287_s29  ;;  %p1293_p2 = scmp.lt.s32.totalorder %s1287_s29, %s1287_s29 }
  0x31   :  { %v372_v2 = vld [vmem:[#allocation2 + $0xe8] sm:$0xff]  ;;  %v373_v4 = vld [vmem:[#allocation2 + $0xf0] sm:$0xff]  ;;  %v358_v5 = vld [vmem:[#allocation2 + $0x78] sm:$0xff] }
  0x32   :  { %1112 = vmatmul.mubr.bf16.gmra.mrb[8].mxu0 %v348_v46  ;;  %v359_v7 = vld [vmem:[#allocation2 + $0x80] sm:$0xff]  ;;  %v360_v8 = vld [vmem:[#allocation2 + $0x88] sm:$0xff]  ;;  %v877_v13 = vld [vmem:[%s1729_s3 + $0x10] sm:$0xff]  ;;  %p1294_p3 = por %p1293_p2, %p1292_p1 }
  0x33   :  { %1115 = vmatprep.mubr.bf16.mxu0 %v349_v48  ;;  %v374_v6 = vld [vmem:[#allocation2 + $0xf8] sm:$0xff]  ;;  %v875_v9 = vld [vmem:[%s1729_s3] sm:$0xff]  ;;  %v876_v10 = vld [vmem:[%s1729_s3 + $0x8] sm:$0xff] }
  0x34   :  { %1148 = vmatmul.mubr.bf16.gmra.mrb[8].mxu1 %v366_v54  ;;  %v1203_v12 = vpack.c.bf16 %v876_v10, %v875_v9  ;;  %v878_v14 = vld [vmem:[%s1729_s3 + $0x18] sm:$0xff]  ;;  %v879_v16 = vld [vmem:[%s1729_s3 + $0x20] sm:$0xff]  ;;  %v880_v17 = vld [vmem:[%s1729_s3 + $0x28] sm:$0xff]  ;;  %p1295_p4 = pnand %p1294_p3, %p1288_p0 }
  0x35   :  { %1151 = vmatprep.mubr.bf16.mxu1 %v367_v56  ;;  %v1206_v15 = vpack.c.bf16 %v878_v14, %v877_v13  ;;  %v1209_v18 = vpack.c.bf16 %v880_v17, %v879_v16  ;;  %v881_v19 = vld [vmem:[%s1729_s3 + $0x30] sm:$0xff]  ;;  %v882_v20 = vld [vmem:[%s1729_s3 + $0x38] sm:$0xff]  ;;  %v1530_v22 = vld [vmem:[%s1728_s2] ss:$0 sm:$0xff] }
  0x36   :  { %1204 = vmatpush3.bf16.msra.mxu1 %v1203_v12  ;;  %v1212_v21 = vpack.c.bf16 %v882_v20, %v881_v19  ;;  %v883_v28 = vld [vmem:[%s1729_s3 + $0x40] sm:$0xff]  ;;  %v884_v29 = vld [vmem:[%s1729_s3 + $0x48] sm:$0xff]  ;;  %v885_v36 = vld [vmem:[%s1729_s3 + $0x50] sm:$0xff] }
  0x37   :  { %1205 = vmatprep.subr.bf16.mxu1 %v1312_v11  ;;  %v1215_v32 = vpack.c.bf16 %v884_v29, %v883_v28  ;;  %v886_v37 = vld [vmem:[%s1729_s3 + $0x58] sm:$0xff]  ;;  %v887_v52 = vld [vmem:[%s1729_s3 + $0x60] sm:$0xff] }
  0x38   :  { %v1218_v42 = vpack.c.bf16 %v886_v37, %v885_v36 }
  0x3a   :  { %1116 = vmatmul.mubr.bf16.gmra.mrb[12].mxu0 %v350_v53  ;;  %1207 = vmatpush3.bf16.msra.mxu1 %v1206_v15  ;;  %v888_v53 = vld [vmem:[%s1729_s3 + $0x68] sm:$0xff] }
  0x3b   :  { %1119 = vmatprep.mubr.bf16.mxu0 %v351_v55  ;;  %1208 = vmatprep.subr.bf16.mxu1 %v1312_v11 }
  0x3c   :  { %1152 = vmatmul.mubr.bf16.gmra.mrb[12].mxu1 %v368_v58  ;;  %v889_v58 = vld [vmem:[%s1729_s3 + $0x70] sm:$0xff] }
  0x3d   :  { %1155 = vmatprep.mubr.bf16.mxu1 %v369_v60  ;;  %v1221_v60 = vpack.c.bf16 %v888_v53, %v887_v52 }
  0x3e   :  { %1210 = vmatpush3.bf16.msra.mxu1 %v1209_v18 }
  0x3f   :  { %1211 = vmatprep.subr.bf16.mxu1 %v1312_v11 }
  0x42   :  { %1120 = vmatmul.mubr.bf16.gmra.mrb[16].mxu0 %v352_v57  ;;  %1213 = vmatpush3.bf16.msra.mxu1 %v1212_v21 }
  0x43   :  { %1123 = vmatprep.mubr.bf16.mxu0 %v353_v59  ;;  %1214 = vmatprep.subr.bf16.mxu1 %v1312_v11  ;;  %v890_v59 = vld [vmem:[%s1729_s3 + $0x78] sm:$0xff] }
  0x44   :  { %1156 = vmatmul.mubr.bf16.gmra.mrb[16].mxu1 %v370_v62 }
  0x45   :  { %1159 = vmatprep.mubr.bf16.mxu1 %v371_v0  ;;  %v1224_v0 = vpack.c.bf16 %v890_v59, %v889_v58 }
  0x46   :  { %1216 = vmatpush3.bf16.msra.mxu1 %v1215_v32 }
  0x47   :  { %1217 = vmatprep.subr.bf16.mxu1 %v1312_v11 }
  0x4a   :  { %1124 = vmatmul.mubr.bf16.gmra.mrb[20].mxu0 %v354_v61  ;;  %1219 = vmatpush3.bf16.msra.mxu1 %v1218_v42 }
  0x4b   :  { %1127 = vmatprep.mubr.bf16.mxu0 %v355_v63  ;;  %1220 = vmatprep.subr.bf16.mxu1 %v1312_v11 }
  0x4c   :  { %1160 = vmatmul.mubr.bf16.gmra.mrb[20].mxu1 %v372_v2 }
  0x4d   :  { %1163 = vmatprep.mubr.bf16.mxu1 %v373_v4 }
  0x4e   :  { %1222 = vmatpush3.bf16.msra.mxu1 %v1221_v60 }
  0x4f   :  { %1223 = vmatprep.subr.bf16.mxu1 %v1312_v11 }
  0x52   :  { %1128 = vmatmul.mubr.bf16.gmra.mrb[24].mxu0 %v356_v1  ;;  %1225 = vmatpush3.bf16.msra.mxu1 %v1224_v0 }
  0x53   :  { %1131 = vmatprep.mubr.bf16.mxu0 %v357_v3 }
  0x54   :  { %1164 = vmatmul.mubr.bf16.gmra.mrb[24].mxu1 %v374_v6 }
  0x5a   :  { %1132 = vmatmul.mubr.bf16.gmra.mrb[28].mxu0 %v358_v5  ;;  %v1314_v5 = vmov 0.0  }
  0x5b   :  { %1135 = vmatprep.mubr.bf16.mxu0 %v359_v7  ;;  %1199 = vmatprep.mubr.msk.f32.mxu1 %vm1313_vm1, %v1314_v5 }
  0x62   :  { %1136 = vmatmul.mubr.bf16.gmra.mrb[32].mxu0 %v360_v8 }
  0xf5   :  { %v1105_v23 = vpop.f32.mrb[0].mxu0 }
  0xf6   :  { %v480_v24 = vpop.f32.mrb[1].mxu0  ;;  %v489_v30 = vadd.f32 %v1105_v23, %v1530_v22  ;;  %v1549_v41 = vpop.f32.mrb[0].mxu1 }
  0xf7   :  { %v481_v25 = vadd.f32 %v1530_v22, %v480_v24  ;;  %v1106_v26 = vpop.f32.mrb[2].mxu0  ;;  %v1551_v44 = vpop.f32.mrb[1].mxu1 }
  0xf8   :  { %v483_v27 = vpop.f32.mrb[3].mxu0  ;;  %v492_v34 = vadd.f32 %v1106_v26, %v1530_v22  ;;  %v737_v38 = vmax.f32 %v489_v30, 0.0  ;;  %v1554_v49 = vpop.f32.mrb[2].mxu1 }
  0xf9   :  { %v484_v31 = vadd.f32 %v1530_v22, %v483_v27  ;;  %v735_v33 = vmax.f32 %v481_v25, 0.0  ;;  %v1556_v51 = vpop.f32.mrb[3].mxu1 }
  0xfa   :  { %v738_v45 = vmax.f32 %v492_v34, 0.0 }
  0xfb   :  { %v736_v35 = vmax.f32 %v484_v31, 0.0 }
  0xfd   :  { %v799_v39 = vadd.f32 %v736_v35, %v735_v33  ;;  %v1109_v40 = vpop.f32.mrb[4].mxu0 }
  0xfe   :  { %v496_v43 = vpop.f32.mrb[5].mxu0  ;;  %v505_v54 = vadd.f32 %v1109_v40, %v1530_v22 }
  0xff   :  { %v800_v46 = vadd.f32 %v799_v39, %v737_v38  ;;  %v497_v47 = vadd.f32 %v1530_v22, %v496_v43  ;;  %v1110_v48 = vpop.f32.mrb[6].mxu0  ;;  %v1574_v4 = vpop.f32.mrb[4].mxu1 }
 0x100   :  { %v499_v50 = vpop.f32.mrb[7].mxu0  ;;  %v508_v62 = vadd.f32 %v1110_v48, %v1530_v22  ;;  %v741_v1 = vmax.f32 %v505_v54, 0.0  ;;  %v1577_v7 = vpop.f32.mrb[5].mxu1 }
 0x101   :  { %v739_v55 = vmax.f32 %v497_v47, 0.0  ;;  %v801_v56 = vadd.f32 %v800_v46, %v738_v45  ;;  %v500_v57 = vadd.f32 %v1530_v22, %v499_v50  ;;  %v1580_v13 = vpop.f32.mrb[6].mxu1 }
 0x102   :  { %v742_v8 = vmax.f32 %v508_v62, 0.0  ;;  %v1582_v15 = vpop.f32.mrb[7].mxu1 }
 0x103   :  { %v802_v61 = vadd.f32 %v801_v56, %v739_v55  ;;  %v740_v63 = vmax.f32 %v500_v57, 0.0 }
 0x105   :  { %v803_v2 = vadd.f32 %v802_v61, %v740_v63  ;;  %v1113_v3 = vpop.f32.mrb[8].mxu0 }
 0x106   :  { %v512_v6 = vpop.f32.mrb[9].mxu0  ;;  %v521_v16 = vadd.f32 %v1113_v3, %v1530_v22 }
 0x107   :  { %v804_v9 = vadd.f32 %v803_v2, %v741_v1  ;;  %v513_v10 = vadd.f32 %v1530_v22, %v512_v6  ;;  %v1114_v12 = vpop.f32.mrb[10].mxu0  ;;  %v1587_v26 = vpop.f32.mrb[8].mxu1 }
 0x108   :  { %v515_v14 = vpop.f32.mrb[11].mxu0  ;;  %v524_v20 = vadd.f32 %v1114_v12, %v1530_v22  ;;  %v745_v23 = vmax.f32 %v521_v16, 0.0  ;;  %v1589_v28 = vpop.f32.mrb[9].mxu1 }
 0x109   :  { %v743_v11 = vmax.f32 %v513_v10, 0.0  ;;  %v805_v17 = vadd.f32 %v804_v9, %v742_v8  ;;  %v516_v18 = vadd.f32 %v1530_v22, %v515_v14  ;;  %v1592_v33 = vpop.f32.mrb[10].mxu1 }
 0x10a   :  { %v746_v29 = vmax.f32 %v524_v20, 0.0  ;;  %v1594_v35 = vpop.f32.mrb[11].mxu1 }
 0x10b   :  { %v806_v19 = vadd.f32 %v805_v17, %v743_v11  ;;  %v744_v21 = vmax.f32 %v516_v18, 0.0 }
 0x10d   :  { %v807_v24 = vadd.f32 %v806_v19, %v744_v21  ;;  %v1117_v25 = vpop.f32.mrb[12].mxu0 }
 0x10e   :  { %v528_v27 = vpop.f32.mrb[13].mxu0  ;;  %v537_v36 = vadd.f32 %v1117_v25, %v1530_v22 }
 0x10f   :  { %v808_v30 = vadd.f32 %v807_v24, %v745_v23  ;;  %v529_v31 = vadd.f32 %v1530_v22, %v528_v27  ;;  %v1118_v32 = vpop.f32.mrb[14].mxu0  ;;  %v1599_v48 = vpop.f32.mrb[12].mxu1 }
 0x110   :  { %v531_v34 = vpop.f32.mrb[15].mxu0  ;;  %v540_v42 = vadd.f32 %v1118_v32, %v1530_v22  ;;  %v749_v45 = vmax.f32 %v537_v36, 0.0  ;;  %v1601_v52 = vpop.f32.mrb[13].mxu1 }
 0x111   :  { %v747_v37 = vmax.f32 %v529_v31, 0.0  ;;  %v809_v38 = vadd.f32 %v808_v30, %v746_v29  ;;  %v532_v39 = vadd.f32 %v1530_v22, %v531_v34  ;;  %v1604_v57 = vpop.f32.mrb[14].mxu1 }
 0x112   :  { %v750_v53 = vmax.f32 %v540_v42, 0.0  ;;  %v1606_v59 = vpop.f32.mrb[15].mxu1 }
 0x113   :  { %v810_v40 = vadd.f32 %v809_v38, %v747_v37  ;;  %v748_v43 = vmax.f32 %v532_v39, 0.0 }
 0x115   :  { %v811_v46 = vadd.f32 %v810_v40, %v748_v43  ;;  %v1121_v47 = vpop.f32.mrb[16].mxu0 }
 0x116   :  { %v544_v50 = vpop.f32.mrb[17].mxu0  ;;  %v553_v60 = vadd.f32 %v1121_v47, %v1530_v22 }
 0x117   :  { %v812_v54 = vadd.f32 %v811_v46, %v749_v45  ;;  %v545_v55 = vadd.f32 %v1530_v22, %v544_v50  ;;  %v1122_v56 = vpop.f32.mrb[18].mxu0  ;;  %v1611_v8 = vpop.f32.mrb[16].mxu1 }
 0x118   :  { %v547_v58 = vpop.f32.mrb[19].mxu0  ;;  %v556_v1 = vadd.f32 %v1122_v56, %v1530_v22  ;;  %v753_v3 = vmax.f32 %v553_v60, 0.0  ;;  %v1613_v10 = vpop.f32.mrb[17].mxu1 }
 0x119   :  { %v751_v61 = vmax.f32 %v545_v55, 0.0  ;;  %v813_v62 = vadd.f32 %v812_v54, %v750_v53  ;;  %v548_v63 = vadd.f32 %v1530_v22, %v547_v58  ;;  %v1616_v17 = vpop.f32.mrb[18].mxu1 }
 0x11a   :  { %v754_v12 = vmax.f32 %v556_v1, 0.0  ;;  %v1618_v19 = vpop.f32.mrb[19].mxu1 }
 0x11b   :  { %v814_v0 = vadd.f32 %v813_v62, %v751_v61  ;;  %v752_v2 = vmax.f32 %v548_v63, 0.0 }
 0x11d   :  { %v815_v5 = vadd.f32 %v814_v0, %v752_v2  ;;  %v1125_v6 = vpop.f32.mrb[20].mxu0 }
 0x11e   :  { %v560_v9 = vpop.f32.mrb[21].mxu0  ;;  %v569_v20 = vadd.f32 %v1125_v6, %v1530_v22 }
 0x11f   :  { %v816_v14 = vadd.f32 %v815_v5, %v753_v3  ;;  %v561_v16 = vadd.f32 %v1530_v22, %v560_v9  ;;  %v1126_v11 = vpop.f32.mrb[22].mxu0  ;;  %v1623_v34 = vpop.f32.mrb[20].mxu1 }
 0x120   :  { %v563_v18 = vpop.f32.mrb[23].mxu0  ;;  %v572_v27 = vadd.f32 %v1126_v11, %v1530_v22  ;;  %v757_v30 = vmax.f32 %v569_v20, 0.0  ;;  %v1625_v37 = vpop.f32.mrb[21].mxu1 }
 0x121   :  { %v755_v21 = vmax.f32 %v561_v16, 0.0  ;;  %v817_v23 = vadd.f32 %v816_v14, %v754_v12  ;;  %v564_v24 = vadd.f32 %v1530_v22, %v563_v18  ;;  %v1628_v43 = vpop.f32.mrb[22].mxu1 }
 0x122   :  { %v758_v38 = vmax.f32 %v572_v27, 0.0  ;;  %v1630_v46 = vpop.f32.mrb[23].mxu1 }
 0x123   :  { %v818_v25 = vadd.f32 %v817_v23, %v755_v21  ;;  %v756_v29 = vmax.f32 %v564_v24, 0.0 }
 0x125   :  { %v819_v31 = vadd.f32 %v818_v25, %v756_v29  ;;  %v1129_v32 = vpop.f32.mrb[24].mxu0 }
 0x126   :  { %v576_v36 = vpop.f32.mrb[25].mxu0  ;;  %v585_v47 = vadd.f32 %v1129_v32, %v1530_v22 }
 0x127   :  { %v820_v39 = vadd.f32 %v819_v31, %v757_v30  ;;  %v577_v40 = vadd.f32 %v1530_v22, %v576_v36  ;;  %v1130_v42 = vpop.f32.mrb[26].mxu0  ;;  %v1635_v63 = vpop.f32.mrb[24].mxu1 }
 0x128   :  { %v579_v45 = vpop.f32.mrb[27].mxu0  ;;  %v588_v56 = vadd.f32 %v1130_v42, %v1530_v22  ;;  %v761_v60 = vmax.f32 %v585_v47, 0.0  ;;  %v1637_v1 = vpop.f32.mrb[25].mxu1 }
 0x129   :  { %v759_v50 = vmax.f32 %v577_v40, 0.0  ;;  %v821_v53 = vadd.f32 %v820_v39, %v758_v38  ;;  %v580_v54 = vadd.f32 %v1530_v22, %v579_v45  ;;  %v1640_v9 = vpop.f32.mrb[26].mxu1 }
 0x12a   :  { %v762_v2 = vmax.f32 %v588_v56, 0.0  ;;  %v1642_v14 = vpop.f32.mrb[27].mxu1 }
 0x12b   :  { %v822_v55 = vadd.f32 %v821_v53, %v759_v50  ;;  %v760_v58 = vmax.f32 %v580_v54, 0.0  ;;  %v625_v54 = vadd.f32 %v1530_v22, %v1551_v44  ;;  %v641_v44 = vadd.f32 %v1530_v22, %v1577_v7 }
 0x12c   :  { %v657_v7 = vadd.f32 %v1530_v22, %v1589_v28  ;;  %v673_v28 = vadd.f32 %v1530_v22, %v1601_v52  ;;  %v689_v52 = vadd.f32 %v1530_v22, %v1613_v10  ;;  %v705_v10 = vadd.f32 %v1530_v22, %v1625_v37 }
 0x12d   :  { %v823_v61 = vadd.f32 %v822_v55, %v760_v58  ;;  %v1133_v62 = vpop.f32.mrb[28].mxu0  ;;  %v721_v37 = vadd.f32 %v1530_v22, %v1637_v1  ;;  %v732_v1 = vadd.f32 %v1640_v9, %v1530_v22  ;;  %v1029_v9 = vld [vmem:[%s1730_s4] ss:$0 sm:$0xff] }
 0x12e   :  { %v592_v0 = vpop.f32.mrb[29].mxu0  ;;  %v601_v16 = vadd.f32 %v1133_v62, %v1530_v22  ;;  %v628_v62 = vadd.f32 %v1530_v22, %v1556_v51  ;;  %v644_v51 = vadd.f32 %v1530_v22, %v1582_v15  ;;  %v660_v15 = vadd.f32 %v1530_v22, %v1594_v35 }
 0x12f   :  { %v824_v3 = vadd.f32 %v823_v61, %v761_v60  ;;  %v593_v5 = vadd.f32 %v1530_v22, %v592_v0  ;;  %v1134_v6 = vpop.f32.mrb[30].mxu0  ;;  %v771_v61 = vmax.f32 %v625_v54, 0.0  ;;  %v633_v0 = vadd.f32 %v1549_v41, %v1530_v22 }
 0x130   :  { %v595_v12 = vpop.f32.mrb[31].mxu0  ;;  %v604_v23 = vadd.f32 %v1134_v6, %v1530_v22  ;;  %v765_v25 = vmax.f32 %v601_v16, 0.0  ;;  %v772_v6 = vmax.f32 %v628_v62, 0.0  ;;  %v649_v41 = vadd.f32 %v1574_v4, %v1530_v22 }
 0x131   :  { %v763_v11 = vmax.f32 %v593_v5, 0.0  ;;  %v825_v18 = vadd.f32 %v824_v3, %v762_v2  ;;  %v596_v20 = vadd.f32 %v1530_v22, %v595_v12  ;;  %v636_v5 = vadd.f32 %v1554_v49, %v1530_v22 }
 0x132   :  { %v766_v31 = vmax.f32 %v604_v23, 0.0  ;;  %v773_v12 = vmax.f32 %v633_v0, 0.0  ;;  %v652_v49 = vadd.f32 %v1580_v13, %v1530_v22  ;;  %v665_v4 = vadd.f32 %v1587_v26, %v1530_v22 }
 0x133   :  { %v826_v21 = vadd.f32 %v825_v18, %v763_v11  ;;  %v764_v24 = vmax.f32 %v596_v20, 0.0  ;;  %v774_v11 = vmax.f32 %v636_v5, 0.0  ;;  %v775_v20 = vmax.f32 %v641_v44, 0.0 }
 0x134   :  { %v668_v13 = vadd.f32 %v1592_v33, %v1530_v22  ;;  %v676_v35 = vadd.f32 %v1530_v22, %v1606_v59  ;;  %v681_v26 = vadd.f32 %v1599_v48, %v1530_v22  ;;  %v684_v33 = vadd.f32 %v1604_v57, %v1530_v22 }
 0x135   :  { %v827_v27 = vadd.f32 %v826_v21, %v764_v24  ;;  %v1137_v29 = vpop.f32.mrb[32].mxu0  ;;  %v776_v24 = vmax.f32 %v644_v51, 0.0  ;;  %v787_v62 = vmax.f32 %v689_v52, 0.0  ;;  %v692_v59 = vadd.f32 %v1530_v22, %v1618_v19 }
 0x136   :  { %v608_v30 = vpop.f32.mrb[33].mxu0  ;;  %v617_v42 = vadd.f32 %v1137_v29, %v1530_v22  ;;  %v778_v29 = vmax.f32 %v652_v49, 0.0  ;;  %v697_v48 = vadd.f32 %v1611_v8, %v1530_v22  ;;  %v700_v57 = vadd.f32 %v1616_v17, %v1530_v22 }
 0x137   :  { %v828_v32 = vadd.f32 %v827_v27, %v765_v25  ;;  %v609_v36 = vadd.f32 %v1530_v22, %v608_v30  ;;  %v1138_v38 = vpop.f32.mrb[34].mxu0  ;;  %v777_v25 = vmax.f32 %v649_v41, 0.0  ;;  %v708_v19 = vadd.f32 %v1530_v22, %v1630_v46 }
 0x138   :  { %v611_v39 = vpop.f32.mrb[35].mxu0  ;;  %v620_v50 = vadd.f32 %v1138_v38, %v1530_v22  ;;  %v769_v55 = vmax.f32 %v617_v42, 0.0  ;;  %v780_v38 = vmax.f32 %v660_v15, 0.0  ;;  %v789_v5 = vmax.f32 %v697_v48, 0.0 }
 0x139   :  { %v1648_v40 = vadd.f32 %v828_v32, %v766_v31  ;;  %v612_v45 = vadd.f32 %v1530_v22, %v611_v39  ;;  %v767_v47 = vmax.f32 %v609_v36, 0.0  ;;  %v779_v31 = vmax.f32 %v657_v7, 0.0 }
 0x13a   :  { %v770_v58 = vmax.f32 %v620_v50, 0.0  ;;  %v781_v39 = vmax.f32 %v665_v4, 0.0  ;;  %v783_v50 = vmax.f32 %v673_v28, 0.0  ;;  %v790_v44 = vmax.f32 %v700_v57, 0.0 }
 0x13b   :  { %v768_v53 = vmax.f32 %v612_v45, 0.0  ;;  %v782_v45 = vmax.f32 %v668_v13, 0.0  ;;  %v713_v8 = vadd.f32 %v1623_v34, %v1530_v22  ;;  %v724_v46 = vadd.f32 %v1530_v22, %v1642_v14 }
 0x13c   :  { %v729_v34 = vadd.f32 %v1635_v63, %v1530_v22  ;;  %v798_v15 = vmax.f32 %v732_v1, 0.0 }
 0x13d   :  { %v836_v56 = vadd.f32 %v768_v53, %v767_v47  ;;  %v793_v51 = vmax.f32 %v713_v8, 0.0 }
 0x13f   :  { %v837_v60 = vadd.f32 %v836_v56, %v769_v55  ;;  %v784_v55 = vmax.f32 %v676_v35, 0.0  ;;  %v785_v56 = vmax.f32 %v681_v26, 0.0 }
 0x141   :  { %v838_v2 = vadd.f32 %v837_v60, %v770_v58  ;;  %v786_v60 = vmax.f32 %v684_v33, 0.0 }
 0x143   :  { %v839_v3 = vadd.f32 %v838_v2, %v771_v61 }
 0x145   :  { %v840_v16 = vadd.f32 %v839_v3, %v772_v6  ;;  %v788_v3 = vmax.f32 %v692_v59, 0.0 }
 0x147   :  { %v841_v18 = vadd.f32 %v840_v16, %v773_v12  ;;  %v791_v16 = vmax.f32 %v705_v10, 0.0 }
 0x149   :  { %v842_v21 = vadd.f32 %v841_v18, %v774_v11  ;;  %v716_v18 = vadd.f32 %v1628_v43, %v1530_v22 }
 0x14b   :  { %v843_v23 = vadd.f32 %v842_v21, %v775_v20  ;;  %v792_v20 = vmax.f32 %v708_v19, 0.0  ;;  %v794_v21 = vmax.f32 %v716_v18, 0.0 }
 0x14d   :  { %v844_v27 = vadd.f32 %v843_v23, %v776_v24  ;;  %v830_v23 = vrot.slane %v1648_v40, 4  ;;  %v795_v24 = vmax.f32 %v721_v37, 0.0 }
 0x14f   :  { %v845_v30 = vadd.f32 %v844_v27, %v777_v25  ;;  %v831_v43 = vadd.f32 %v830_v23, %v1648_v40  ;;  %v796_v27 = vmax.f32 %v724_v46, 0.0 }
 0x151   :  { %v846_v32 = vadd.f32 %v845_v30, %v778_v29  ;;  %v797_v29 = vmax.f32 %v729_v34, 0.0 }
 0x153   :  { %v847_v36 = vadd.f32 %v846_v32, %v779_v31  ;;  %v832_v31 = vrot.slane %v831_v43, 2 }
 0x155   :  { %v848_v42 = vadd.f32 %v847_v36, %v780_v38  ;;  %v833_v36 = vadd.f32 %v832_v31, %v831_v43 }
 0x157   :  { %v849_v47 = vadd.f32 %v848_v42, %v781_v39  ;;  %v834_v28 = vrot.slane %v833_v36, 1 }
 0x159   :  { %v850_v53 = vadd.f32 %v849_v47, %v782_v45  ;;  %v835_v39 = vadd.f32 %v834_v28, %v833_v36 }
 0x15b   :  { %v851_v54 = vadd.f32 %v850_v53, %v783_v50  ;;  %v873_v45 = vmul.f32 0.00390625, %v835_v39 }
 0x15d   :  { %v852_v58 = vadd.f32 %v851_v54, %v784_v55 }
 0x15f   :  { %v853_v61 = vadd.f32 %v852_v58, %v785_v56 }
 0x161   :  { %v854_v0 = vadd.f32 %v853_v61, %v786_v60 }
 0x163   :  { %v855_v2 = vadd.f32 %v854_v0, %v787_v62 }
 0x165   :  { %v856_v6 = vadd.f32 %v855_v2, %v788_v3 }
 0x167   :  { %v857_v12 = vadd.f32 %v856_v6, %v789_v5 }
 0x169   :  { %v858_v11 = vadd.f32 %v857_v12, %v790_v44 }
 0x16b   :  { %v859_v17 = vadd.f32 %v858_v11, %v791_v16 }
 0x16d   :  { %v860_v41 = vadd.f32 %v859_v17, %v792_v20 }
 0x16f   :  { %v861_v49 = vadd.f32 %v860_v41, %v793_v51 }
 0x171   :  { %v862_v7 = vadd.f32 %v861_v49, %v794_v21 }
 0x173   :  { %v863_v25 = vadd.f32 %v862_v7, %v795_v24 }
 0x175   :  { %v864_v30 = vadd.f32 %v863_v25, %v796_v27 }
 0x177   :  { %v865_v4 = vadd.f32 %v864_v30, %v797_v29 }
 0x179   :  { %v866_v32 = vadd.f32 %v865_v4, %v798_v15 }
 0x17b   :  { %v867_v13 = vrot.slane %v866_v32, 4 }
 0x17d   :  { %v868_v14 = vadd.f32 %v867_v13, %v866_v32 }
 0x17f   :  { %v869_v38 = vrot.slane %v868_v14, 2 }
 0x181   :  { %v870_v63 = vadd.f32 %v869_v38, %v868_v14 }
 0x183   :  { %v871_v42 = vrot.slane %v870_v63, 1 }
 0x185   :  { %v872_v40 = vadd.f32 %v871_v42, %v870_v63 }
 0x187   :  { %v874_v47 = vmul.f32 0.00390625, %v872_v40 }
 0x189   :  { %v901_v22 = vsel %vm900_vm2, %v874_v47, %v873_v45 }
 0x18a   :  { %1200 = vmatmul.mubr.f32.vlgmr.msra.gmra.mrb[28].mxu1 %v901_v22 }
 0x25d   :  { %v969_v50 = vpop.f32.mrb[28].mxu1 }
 0x25e   :  { %v970_v35 = vadd.f32 %v1029_v9, %v969_v50  ;;  %v1201_v26 = vpop.f32.mrb[29].mxu1 }
 0x260   :  { %973 = vst [vmem:[#allocation3] sm:$0x3] %v970_v35 }
 0x261   :  { %1298 = shalt.err (!%p1295_p4)
}
 0x262   :  { %s1299_s7 = scalar_lea.hbm %s1731_s5, 32 }
 0x263   :  { %p1300_p5 = scmp.ne.s32.totalorder %s1731_s5, %s1299_s7  ;;  %p1303_p6 = scmp.lt.u32.totalorder %s1299_s7, %s1731_s5 }
 0x265   :  { %p1305_p7 = pnand %p1303_p6, %p1300_p5 }
 0x267   :  { %1308 = shalt.err (!%p1305_p7)
}
 0x268   :  { %983 = dma.vmem_to_hbm [thread:$0]  %s981_s28, 32, %s1731_s5, [#allocation4]  }
 0x269   :  { %1309 = dma.done.wait [#allocation4], 32  }
 0x26a   :  { %1310 = vsyncadd [#allocation4], 4294967264 }
 0x26b   :  { %987 = vsyncpa [#allocation4], 1 }

</bundles_post_ra>
